<compile_context>
chip_gen: v7x
topology: tpu7x:2x2x1
jax: 0.10.0
libtpu: 0.0.40
codegen_flags: <defaults>
</compile_context>

<pallas_src>
import jax
import jax.numpy as jnp
from jax.experimental import pallas as pl
from jax.experimental.pallas import tpu as pltpu


# ----------------------------------------------------------------------------
# Single fused kernel: im2col-matmul conv (all branches) + bias + ReLU
#                      + masked max-pool over time + final FC, lane-dense out
# ----------------------------------------------------------------------------
def textcnn_fused_kernel(x_ref, w_ref, b_ref, mask_ref, fcw_ref, fcb_ref, out_ref):
    # x_ref    : (Bt, L_pad, K)  im2col windows (compute dtype, e.g. bf16)
    # w_ref    : (K, nF)         fused conv weights, zero-padded per branch
    # b_ref    : (1, nF)         conv bias (f32)
    # mask_ref : (L_pad, nF)     1.0 where (t, channel) is a valid conv position
    # fcw_ref  : (nF, C_pad)     fc weight, lane-padded to 128 (f32)
    # fcb_ref  : (1, C_pad)      fc bias, lane-padded (f32)
    # out_ref  : (Bt, C_pad)     logits slab (f32, lane-dense)
    bt, l_pad, k = x_ref.shape
    nf = w_ref.shape[1]

    # One MXU contraction for all batch rows / time steps / conv branches.
    # L_pad is a multiple of 8 (and 16 for bf16), so this reshape is a
    # layout no-op (no sublane relayout).
    x2 = x_ref[...].reshape(bt * l_pad, k)
    scores = jnp.dot(x2, w_ref[...], preferred_element_type=jnp.float32)  # (Bt*L_pad, nF)

    # Epilogue in f32 on the VPU (v5e has no bf16 VPU).
    act = jnp.maximum(scores + b_ref[...], 0.0)
    act = act.reshape(bt, l_pad, nf) * mask_ref[...]      # zero out invalid positions
    pooled = jnp.max(act, axis=1)                         # (Bt, nF), exact: ReLU >= 0

    # Fused final Linear; output is lane-dense (C_pad = 128 multiple).
    out_ref[...] = (
        jnp.dot(pooled, fcw_ref[...], preferred_element_type=jnp.float32)
        + fcb_ref[...]
    )


# ----------------------------------------------------------------------------
# Parameter fusion (done once in a real deployment): pad / stack conv weights,
# build validity mask, lane-pad the FC weights.
# ----------------------------------------------------------------------------
def prepare_fused_params(params, filter_sizes, seq_len, *, compute_dtype=jnp.bfloat16):
    E = params["embedding"].shape[1]
    F = params["conv_w"][0].shape[0]
    n_br = len(filter_sizes)
    nF = n_br * F
    C = params["fc_b"].shape[0]
    fs_max = max(filter_sizes)
    fs_min = min(filter_sizes)

    L = seq_len - fs_min + 1            # max number of conv positions (shortest filter)
    L_pad = -(-L // 8) * 8              # sublane-align the time axis
    K = fs_max * E                      # im2col contraction depth
    C_pad = -(-C // 128) * 128          # lane-dense output width

    # Fused conv weight: (K, nF), branch i occupies columns [i*F, (i+1)*F),
    # rows j*E + e with zeros for j >= fs_i.
    w_parts = []
    for i, fs in enumerate(filter_sizes):
        w = jnp.transpose(params["conv_w"][i][:, 0], (1, 2, 0))        # (fs, E, F)
        w = jnp.pad(w, ((0, fs_max - fs), (0, 0), (0, 0)))             # (fs_max, E, F)
        w_parts.append(w.reshape(K, F))
    w_big = jnp.concatenate(w_parts, axis=1).astype(compute_dtype)     # (K, nF)

    conv_b = jnp.concatenate(params["conv_b"])[None, :].astype(jnp.float32)  # (1, nF)

    # Validity mask: position t is valid for branch i iff t < seq_len - fs_i + 1.
    l_out_per_ch = jnp.repeat(
        jnp.asarray([seq_len - fs + 1 for fs in filter_sizes], jnp.int32), F)     # (nF,)
    mask = (jnp.arange(L_pad, dtype=jnp.int32)[:, None] < l_out_per_ch[None, :])
    mask = mask.astype(jnp.float32)                                              # (L_pad, nF)

    fc_w = jnp.pad(params["fc_w"].T.astype(jnp.float32),
                   ((0, 0), (0, C_pad - C)))                                     # (nF, C_pad)
    fc_b = jnp.pad(params["fc_b"].astype(jnp.float32), (0, C_pad - C))[None, :]  # (1, C_pad)

    meta = dict(E=E, F=F, nF=nF, C=C, C_pad=C_pad, L=L, L_pad=L_pad, K=K, fs_max=fs_max)
    return dict(w_big=w_big, conv_b=conv_b, mask=mask, fc_w=fc_w, fc_b=fc_b), meta


# ----------------------------------------------------------------------------
# Full forward: embedding lookup + im2col are glue; everything else is the
# single fused pallas_call.
# ----------------------------------------------------------------------------
def textcnn_forward(text, params, filter_sizes, *, compute_dtype=jnp.bfloat16,
                    batch_tile=None):
    B, S = text.shape
    fused, m = prepare_fused_params(params, filter_sizes, S, compute_dtype=compute_dtype)
    L_pad, K, nF, C_pad = m["L_pad"], m["K"], m["nF"], m["C_pad"]
    fs_max, E = m["fs_max"], m["E"]

    # Glue: embedding gather + im2col (precomputed in the wrapper so the kernel
    # does a single aligned contraction instead of fs sublane-offset slices).
    emb = jnp.take(params["embedding"], text, axis=0)                  # (B, S, E)
    S_pad = L_pad + fs_max - 1
    emb_p = jnp.pad(emb, ((0, 0), (0, S_pad - S), (0, 0)))
    x = jnp.concatenate([emb_p[:, j:j + L_pad, :] for j in range(fs_max)],
                        axis=-1).astype(compute_dtype)                 # (B, L_pad, K)

    # Batch tiling: whole batch per grid step at small B; for large B use
    # multiple-of-8 tiles (and >=2 tiles on v7x so both TensorCores get work),
    # sized so (x tile + weights + output) * 2 buffers fits scoped VMEM.
    if batch_tile is None:
        batch_tile = B if B <= 8 else 8
    B_pad = -(-B // batch_tile) * batch_tile
    if B_pad != B:
        x = jnp.pad(x, ((0, B_pad - B), (0, 0), (0, 0)))
    grid = (B_pad // batch_tile,)

    out = pl.pallas_call(
        textcnn_fused_kernel,
        out_shape=jax.ShapeDtypeStruct((B_pad, C_pad), jnp.float32),
        grid_spec=pltpu.PrefetchScalarGridSpec(
            num_scalar_prefetch=0,
            grid=grid,
            in_specs=[
                pl.BlockSpec((batch_tile, L_pad, K), lambda i: (i, 0, 0)),
                pl.BlockSpec((K, nF), lambda i: (0, 0)),
                pl.BlockSpec((1, nF), lambda i: (0, 0)),
                pl.BlockSpec((L_pad, nF), lambda i: (0, 0)),
                pl.BlockSpec((nF, C_pad), lambda i: (0, 0)),
                pl.BlockSpec((1, C_pad), lambda i: (0, 0)),
            ],
            out_specs=pl.BlockSpec((batch_tile, C_pad), lambda i: (i, 0)),
        ),
        compiler_params=pltpu.CompilerParams(
            dimension_semantics=("parallel",)),
    )(x, fused["w_big"], fused["conv_b"], fused["mask"], fused["fc_w"], fused["fc_b"])

    return out[:B, :m["C"]]


# ----------------------------------------------------------------------------
# Pure-JAX reference mirroring the PyTorch module (same bf16 cast on the conv
# matmul inputs as the kernel, accumulation in f32).
# ----------------------------------------------------------------------------
def cnn_forward_ref(text, params, filter_sizes, *, compute_dtype=jnp.bfloat16):
    emb = jnp.take(params["embedding"], text, axis=0)                  # (B, S, E)
    S = emb.shape[1]
    pooled = []
    for i, fs in enumerate(filter_sizes):
        w = params["conv_w"][i][:, 0]                                  # (F, fs, E)
        b = params["conv_b"][i]
        l_out = S - fs + 1
        windows = jnp.stack([emb[:, j:j + l_out, :] for j in range(fs)], axis=2)  # (B,l_out,fs,E)
        conv = jnp.einsum(
            "btje,fje->btf",
            windows.astype(compute_dtype), w.astype(compute_dtype),
            preferred_element_type=jnp.float32,
        ) + b
        act = jnp.maximum(conv, 0.0)
        pooled.append(jnp.max(act, axis=1))                            # (B, F)
    cat = jnp.concatenate(pooled, axis=1)
    # dropout is identity at inference
    return cat @ params["fc_w"].T + params["fc_b"]


if __name__ == "__main__":
    # Small shapes consistent with the module.
    batch = 2
    seq_len = 16
    vocabulary_size = 50
    embedding_dim = 32
    filter_num = 8
    filter_sizes = (3, 4, 5)
    class_num = 4

    key = jax.random.PRNGKey(0)
    ks = jax.random.split(key, 3 + 2 * len(filter_sizes))

    params = {
        "embedding": jax.random.normal(
            ks[0], (vocabulary_size, embedding_dim), jnp.float32) * 0.1,
        # torch Conv2d weight layout: (out_channels=F, in_channels=1, fs, E)
        "conv_w": [
            jax.random.normal(
                ks[2 + 2 * i], (filter_num, 1, fs, embedding_dim), jnp.float32) * 0.1
            for i, fs in enumerate(filter_sizes)
        ],
        "conv_b": [
            jax.random.normal(ks[3 + 2 * i], (filter_num,), jnp.float32) * 0.1
            for i, _ in enumerate(filter_sizes)
        ],
        # torch Linear layout: (class_num, len(fs)*F)
        "fc_w": jax.random.normal(
            ks[1], (class_num, len(filter_sizes) * filter_num), jnp.float32) * 0.1,
        "fc_b": jnp.zeros((class_num,), jnp.float32),
    }

    text = jax.random.randint(
        jax.random.PRNGKey(42), (batch, seq_len), 0, vocabulary_size, jnp.int32)

    out = textcnn_forward(text, params, filter_sizes)
    out = jax.block_until_ready(out)

    ref = cnn_forward_ref(text, params, filter_sizes)
    assert out.shape == (batch, class_num)
    assert jnp.allclose(out, ref, atol=1e-3, rtol=1e-3), \
        float(jnp.max(jnp.abs(out - ref)))

    print("KERNEL_OK")
</pallas_src>

<mosaic_0001>
module attributes {stable_mosaic.version = 11 : i64} {
  func.func @textcnn_fused_kernel(%arg0: i32, %arg1: memref<2x16x160xbf16, #tpu.memory_space<vmem>>, %arg2: memref<160x24xbf16, #tpu.memory_space<vmem>>, %arg3: memref<1x24xf32, #tpu.memory_space<vmem>>, %arg4: memref<16x24xf32, #tpu.memory_space<vmem>>, %arg5: memref<24x128xf32, #tpu.memory_space<vmem>>, %arg6: memref<1x128xf32, #tpu.memory_space<vmem>>, %arg7: memref<2x128xf32, #tpu.memory_space<vmem>>) attributes {dimension_semantics = [#tpu.dimension_semantics<parallel>], iteration_bounds = array<i64: 1>, scalar_prefetch = 0 : i64, scratch_operands = 0 : i64, tpu.core_type = #tpu.core_type<tc>, window_params = [{transform_indices = @transform_0, window_bounds = array<i64: 2, 16, 160>}, {pipeline_mode = #tpu.pipeline_mode<synchronous>, transform_indices = @transform_1, window_bounds = array<i64: 160, 24>}, {pipeline_mode = #tpu.pipeline_mode<synchronous>, transform_indices = @transform_2, window_bounds = array<i64: 1, 24>}, {pipeline_mode = #tpu.pipeline_mode<synchronous>, transform_indices = @transform_3, window_bounds = array<i64: 16, 24>}, {pipeline_mode = #tpu.pipeline_mode<synchronous>, transform_indices = @transform_4, window_bounds = array<i64: 24, 128>}, {pipeline_mode = #tpu.pipeline_mode<synchronous>, transform_indices = @transform_5, window_bounds = array<i64: 1, 128>}, {transform_indices = @transform_6, window_bounds = array<i64: 2, 128>}]} {
    %c0 = arith.constant 0 : index
    %c0_0 = arith.constant 0 : index
    %c0_1 = arith.constant 0 : index
    %0 = vector.load %arg1[%c0, %c0_0, %c0_1] : memref<2x16x160xbf16, #tpu.memory_space<vmem>>, vector<2x16x160xbf16>
    %1 = vector.shape_cast %0 : vector<2x16x160xbf16> to vector<32x160xbf16>
    %c0_2 = arith.constant 0 : index
    %c0_3 = arith.constant 0 : index
    %2 = vector.load %arg2[%c0_2, %c0_3] : memref<160x24xbf16, #tpu.memory_space<vmem>>, vector<160x24xbf16>
    %cst = arith.constant dense<0.000000e+00> : vector<32x24xf32>
    %3 = tpu.matmul %1, %2, %cst {dimension_numbers = #tpu.dot_dimension_numbers<[1], [0], [0], [1], [0, 0, 1, 1], [], []>} : vector<32x160xbf16>, vector<160x24xbf16>, vector<32x24xf32> -> vector<32x24xf32>
    %c0_4 = arith.constant 0 : index
    %c0_5 = arith.constant 0 : index
    %4 = vector.load %arg3[%c0_4, %c0_5] : memref<1x24xf32, #tpu.memory_space<vmem>>, vector<1x24xf32>
    %5 = vector.broadcast %4 : vector<1x24xf32> to vector<32x24xf32>
    %6 = arith.addf %3, %5 : vector<32x24xf32>
    %cst_6 = arith.constant 0.000000e+00 : f32
    %7 = vector.broadcast %cst_6 : f32 to vector<32x24xf32>
    %8 = arith.maximumf %6, %7 : vector<32x24xf32>
    %9 = vector.shape_cast %8 : vector<32x24xf32> to vector<2x16x24xf32>
    %c0_7 = arith.constant 0 : index
    %c0_8 = arith.constant 0 : index
    %10 = vector.load %arg4[%c0_7, %c0_8] : memref<16x24xf32, #tpu.memory_space<vmem>>, vector<16x24xf32>
    %11 = vector.shape_cast %10 : vector<16x24xf32> to vector<1x16x24xf32>
    %12 = vector.broadcast %11 : vector<1x16x24xf32> to vector<2x16x24xf32>
    %13 = arith.mulf %9, %12 : vector<2x16x24xf32>
    %cst_9 = arith.constant dense<0xFF800000> : vector<2x24xf32>
    %14 = vector.multi_reduction <maximumf>, %13, %cst_9 [1] : vector<2x16x24xf32> to vector<2x24xf32>
    %c0_10 = arith.constant 0 : index
    %c0_11 = arith.constant 0 : index
    %15 = vector.load %arg5[%c0_10, %c0_11] : memref<24x128xf32, #tpu.memory_space<vmem>>, vector<24x128xf32>
    %cst_12 = arith.constant dense<0.000000e+00> : vector<2x128xf32>
    %16 = tpu.matmul %14, %15, %cst_12 {dimension_numbers = #tpu.dot_dimension_numbers<[1], [0], [0], [1], [0, 0, 1, 1], [], []>} : vector<2x24xf32>, vector<24x128xf32>, vector<2x128xf32> -> vector<2x128xf32>
    %c0_13 = arith.constant 0 : index
    %c0_14 = arith.constant 0 : index
    %17 = vector.load %arg6[%c0_13, %c0_14] : memref<1x128xf32, #tpu.memory_space<vmem>>, vector<1x128xf32>
    %18 = vector.broadcast %17 : vector<1x128xf32> to vector<2x128xf32>
    %19 = arith.addf %16, %18 : vector<2x128xf32>
    %c0_15 = arith.constant 0 : index
    %c0_16 = arith.constant 0 : index
    %20 = vector.load %arg7[%c0_15, %c0_16] : memref<2x128xf32, #tpu.memory_space<vmem>>, vector<2x128xf32>
    tpu.vector_store %arg7[%c0_15, %c0_16], %19 {strides = array<i32>} : memref<2x128xf32, #tpu.memory_space<vmem>>, vector<2x128xf32>,
    return
  }
  func.func @transform_0(%arg0: i32) -> (i32, i32, i32) {
    %c0_i32 = arith.constant 0 : i32
    %c0_i32_0 = arith.constant 0 : i32
    %c0_i32_1 = arith.constant 0 : i32
    return %arg0, %c0_i32, %c0_i32_0 : i32, i32, i32
  }
  func.func @transform_1(%arg0: i32) -> (i32, i32) {
    %c0_i32 = arith.constant 0 : i32
    %c0_i32_0 = arith.constant 0 : i32
    %c0_i32_1 = arith.constant 0 : i32
    return %c0_i32, %c0_i32_0 : i32, i32
  }
  func.func @transform_2(%arg0: i32) -> (i32, i32) {
    %c0_i32 = arith.constant 0 : i32
    %c0_i32_0 = arith.constant 0 : i32
    %c0_i32_1 = arith.constant 0 : i32
    return %c0_i32, %c0_i32_0 : i32, i32
  }
  func.func @transform_3(%arg0: i32) -> (i32, i32) {
    %c0_i32 = arith.constant 0 : i32
    %c0_i32_0 = arith.constant 0 : i32
    %c0_i32_1 = arith.constant 0 : i32
    return %c0_i32, %c0_i32_0 : i32, i32
  }
  func.func @transform_4(%arg0: i32) -> (i32, i32) {
    %c0_i32 = arith.constant 0 : i32
    %c0_i32_0 = arith.constant 0 : i32
    %c0_i32_1 = arith.constant 0 : i32
    return %c0_i32, %c0_i32_0 : i32, i32
  }
  func.func @transform_5(%arg0: i32) -> (i32, i32) {
    %c0_i32 = arith.constant 0 : i32
    %c0_i32_0 = arith.constant 0 : i32
    %c0_i32_1 = arith.constant 0 : i32
    return %c0_i32, %c0_i32_0 : i32, i32
  }
  func.func @transform_6(%arg0: i32) -> (i32, i32) {
    %c0_i32 = arith.constant 0 : i32
    %c0_i32_0 = arith.constant 0 : i32
    return %arg0, %c0_i32 : i32, i32
  }
}

</mosaic_0001>

<bundles_post_ra>
// kernel: tpu_custom_call.1
= control target key start
LH: loop header
LB: loop body
LE: loop exit
PB: predicated region body
PF: predicated region fallthrough
CT: control target
= control target key end

     0   :  { %v420_v1 = vmov 0   ;;  %vm134_vm0 = vcmask 261120   ;;  %s540_s0 = inlined_call_operand.vmem [shape: bf16[2,16,160], index: 0, kind: input, shape index: {}]   ;;  %s541_s1 = inlined_call_operand.vmem [shape: bf16[160,24], index: 1, kind: input, shape index: {}]   ;;  %s542_s2 = inlined_call_operand.vmem [shape: f32[1,24], index: 2, kind: input, shape index: {}]   ;;  %s543_s3 = inlined_call_operand.vmem [shape: f32[16,24], index: 3, kind: input, shape index: {}]   ;;  %s544_s4 = inlined_call_operand.vmem [shape: f32[24,128], index: 4, kind: input, shape index: {}]   ;;  %s545_s5 = inlined_call_operand.vmem [shape: f32[1,128], index: 5, kind: input, shape index: {}]   ;;  %s546_s6 = inlined_call_operand.hbm [shape: f32[2,128], index: 6, kind: output, shape index: {}]  }
   0x1   :  { %v380_v0 = vld [vmem:[%s541_s1] sm:$0xff]   ;;  %141 = vmatprep.subr.bf16.mxu0 %v420_v1  ;;  %355 = vmatprep.subr.bf16.mxu1 %v420_v1  ;;  %v381_v2 = vld [vmem:[%s541_s1 + $0x8] sm:$0xff]   ;;  %v382_v3 = vld [vmem:[%s541_s1 + $0x10] sm:$0xff]  }
   0x2   :  { %142 = vmatpush1.bf16.msra.mxu0 %v380_v0  ;;  %365 = vmatpush1.bf16.msra.mxu1 %v380_v0  ;;  %v383_v4 = vld [vmem:[%s541_s1 + $0x18] sm:$0xff]   ;;  %v392_v5 = vld [vmem:[%s540_s0 + $0x4] ss:$8 sps:$4 sm:$0xff]  }
   0x3   :  { %143 = vmatprep.subr.bf16.mxu0 %v420_v1  ;;  %356 = vmatprep.subr.bf16.mxu1 %v420_v1  ;;  %v395_v6 = vld [vmem:[%s540_s0 + $0x14] ss:$8 sps:$4 sm:$0xff]  }
   0x4   :  { %335 = vmatprep.mubr.msk.bf16.mxu0 %vm134_vm0, %v392_v5 }
   0x6   :  { %144 = vmatpush1.bf16.msra.mxu0 %v381_v2  ;;  %366 = vmatpush1.bf16.msra.mxu1 %v381_v2 }
   0x7   :  { %145 = vmatprep.subr.bf16.mxu0 %v420_v1  ;;  %357 = vmatprep.subr.bf16.mxu1 %v420_v1 }
   0xa   :  { %146 = vmatpush1.bf16.msra.mxu0 %v382_v3  ;;  %367 = vmatpush1.bf16.msra.mxu1 %v382_v3 }
   0xb   :  { %147 = vmatprep.subr.bf16.mxu0 %v420_v1  ;;  %358 = vmatprep.subr.bf16.mxu1 %v420_v1 }
   0xc   :  { %11 = vsyncpa [#allocation3], 0  ;;  %v384_v7 = vld [vmem:[%s541_s1 + $0x20] sm:$0xff]   ;;  %336 = vmatprep.mubr.msk.bf16.mxu1 %vm134_vm0, %v395_v6  ;;  %v385_v8 = vld [vmem:[%s541_s1 + $0x28] sm:$0xff]   ;;  %v421_v18 = vmov 0.0|0.0   ;;  %v422_v19 = vmov 0.0  }
   0xd   :  { %v386_v9 = vld [vmem:[%s541_s1 + $0x30] sm:$0xff]   ;;  %v387_v10 = vld [vmem:[%s541_s1 + $0x38] sm:$0xff]   ;;  %v388_v11 = vld [vmem:[%s541_s1 + $0x40] sm:$0xff]   ;;  %vm423_vm1 = vmmov 0   ;;  %vm200_vm2 = vcmask 195584   ;;  %vm231_vm3 = vcmask 1041409  }
   0xe   :  { %148 = vmatpush1.bf16.msra.mxu0 %v383_v4  ;;  %368 = vmatpush1.bf16.msra.mxu1 %v383_v4  ;;  %v389_v12 = vld [vmem:[%s541_s1 + $0x48] sm:$0xff]   ;;  %v393_v14 = vld [vmem:[%s540_s0 + $0x10] ss:$8 sps:$4 sm:$0xff]   ;;  %v219_v15 = vld [vmem:[%s544_s4] sm:$0xff]  ;;  %s424_s10 = smov [#allocation2]  }
   0xf   :  { %149 = vmatprep.subr.bf16.mxu0 %v420_v1  ;;  %359 = vmatprep.subr.bf16.mxu1 %v420_v1  ;;  %v390_v13 = vld [vmem:[%s540_s0] ss:$8 sps:$4 sm:$0xff]   ;;  %v221_v20 = vld [vmem:[%s544_s4 + $0x10] sm:$0xff]  ;;  %s312_s11 = sshll.u32 %s424_s10, 4  ;;  %s313_s11 = int_to_ptr.vmem [resolvable:$true] %s312_s11 }
  0x10   :  { %v220_v16 = vld [vmem:[%s544_s4 + $0x8] sm:$0xff]  ;;  %v320_v21 = vld [vmem:[%s542_s2] ss:$0 sm:$0xff]  ;;  %s396_s12 = scalar_lea.vmem %s313_s11, 32  ;;  %p401_p1 = scmp.lt.s32.totalorder %s313_s11, %s313_s11 }
  0x11   :  { %v353_v17 = vpack.c.bf16 %v220_v16, %v219_v15  ;;  %v194_v28 = vld [vmem:[%s543_s3] sm:$0xff]  ;;  %v195_v37 = vld [vmem:[%s543_s3 + $0x8] sm:$0xff]  ;;  %p397_p0 = scmp.ne.s32.totalorder %s313_s11, %s396_s12  ;;  %p402_p2 = scmp.lt.s32.totalorder %s396_s12, %s396_s12 }
  0x12   :  { %150 = vmatpush1.bf16.msra.mxu0 %v384_v7  ;;  %369 = vmatpush1.bf16.msra.mxu1 %v384_v7  ;;  %v337_v63 = vld [vmem:[%s545_s5] ss:$0 sm:$0xff] }
  0x13   :  { %151 = vmatprep.subr.bf16.mxu0 %v420_v1  ;;  %360 = vmatprep.subr.bf16.mxu1 %v420_v1  ;;  %p403_p3 = por %p402_p2, %p401_p1 }
  0x15   :  { %p404_p4 = pnand %p403_p3, %p397_p0 }
  0x16   :  { %152 = vmatpush1.bf16.msra.mxu0 %v385_v8  ;;  %370 = vmatpush1.bf16.msra.mxu1 %v385_v8 }
  0x17   :  { %153 = vmatprep.subr.bf16.mxu0 %v420_v1  ;;  %361 = vmatprep.subr.bf16.mxu1 %v420_v1 }
  0x1a   :  { %154 = vmatpush1.bf16.msra.mxu0 %v386_v9  ;;  %371 = vmatpush1.bf16.msra.mxu1 %v386_v9 }
  0x1b   :  { %155 = vmatprep.subr.bf16.mxu0 %v420_v1  ;;  %362 = vmatprep.subr.bf16.mxu1 %v420_v1 }
  0x1e   :  { %156 = vmatpush1.bf16.msra.mxu0 %v387_v10  ;;  %372 = vmatpush1.bf16.msra.mxu1 %v387_v10 }
  0x1f   :  { %157 = vmatprep.subr.bf16.mxu0 %v420_v1  ;;  %363 = vmatprep.subr.bf16.mxu1 %v420_v1 }
  0x22   :  { %158 = vmatpush1.bf16.msra.mxu0 %v388_v11  ;;  %373 = vmatpush1.bf16.msra.mxu1 %v388_v11 }
  0x23   :  { %159 = vmatprep.subr.bf16.mxu0 %v420_v1  ;;  %364 = vmatprep.subr.bf16.mxu1 %v420_v1 }
  0x26   :  { %160 = vmatpush1.bf16.msra.mxu0 %v389_v12  ;;  %374 = vmatpush1.bf16.msra.mxu1 %v389_v12 }
  0x27   :  { %352 = vmatprep.subr.bf16.mxu1 %v421_v18 }
  0x29   :  { %174 = vmatmul.mubr.bf16.vlgmr.msra.gmra.mrb[0].mxu0 %v390_v13  ;;  %182 = vmatmul.mubr.bf16.vlgmr.msra.gmra.mrb[0].mxu1 %v393_v14 }
  0x2a   :  { %354 = vmatpush3.bf16.msra.mxu1 %v353_v17  ;;  %349 = vmatprep.mubr.msk.f32.mxu1 %vm423_vm1, %v422_v19 }
  0x2b   :  { %347 = vmatprep.subr.mxu1 %v422_v19 }
  0x2e   :  { %348 = vmatpush3.msra.mxu1 %v221_v20 }
  0xfc   :  { %v175_v22 = vpop.f32.mrb[0].mxu0  ;;  %v183_v23 = vpop.f32.mrb[0].mxu1 }
  0xfd   :  { %v176_v24 = vadd.f32 %v320_v21, %v175_v22  ;;  %v184_v25 = vadd.f32 %v320_v21, %v183_v23  ;;  %v177_v26 = vpop.f32.mrb[1].mxu0  ;;  %v185_v27 = vpop.f32.mrb[1].mxu1 }
  0xfe   :  { %v178_v29 = vpop.f32.mrb[2].mxu0  ;;  %v186_v30 = vpop.f32.mrb[2].mxu1 }
  0xff   :  { %v190_v31 = vmax.f32 %v176_v24, 0.0  ;;  %v192_v32 = vmax.f32 %v184_v25, 0.0  ;;  %v179_v33 = vadd.f32 %v320_v21, %v178_v29  ;;  %v187_v34 = vadd.f32 %v320_v21, %v186_v30  ;;  %v180_v35 = vpop.f32.mrb[3].mxu0  ;;  %v188_v36 = vpop.f32.mrb[3].mxu1 }
 0x101   :  { %v196_v38 = vmul.f32 %v194_v28, %v190_v31  ;;  %v198_v39 = vmul.f32 %v194_v28, %v192_v32  ;;  %v191_v40 = vmax.f32 %v179_v33, 0.0  ;;  %v193_v41 = vmax.f32 %v187_v34, 0.0 }
 0x103   :  { %v197_v42 = vmul.f32 %v195_v37, %v191_v40  ;;  %v199_v43 = vmul.f32 %v195_v37, %v193_v41  ;;  %v201_v44 = vsel %vm200_vm2, %v196_v38, -inf  ;;  %v210_v45 = vsel %vm200_vm2, %v198_v39, -inf }
 0x105   :  { %v202_v46 = vsel %vm200_vm2, %v197_v42, -inf  ;;  %v211_v47 = vsel %vm200_vm2, %v199_v43, -inf }
 0x106   :  { %v203_v48 = vmax.f32 %v201_v44, %v202_v46  ;;  %v212_v49 = vmax.f32 %v210_v45, %v211_v47 }
 0x108   :  { %v204_v50 = vrot.slane %v203_v48, 4  ;;  %v213_v51 = vrot.slane %v212_v49, 4 }
 0x10a   :  { %v205_v52 = vmax.f32 %v203_v48, %v204_v50  ;;  %v214_v53 = vmax.f32 %v212_v49, %v213_v51 }
 0x10c   :  { %v206_v54 = vrot.slane %v205_v52, 2  ;;  %v215_v55 = vrot.slane %v214_v53, 2 }
 0x10e   :  { %v207_v56 = vmax.f32 %v205_v52, %v206_v54  ;;  %v216_v57 = vmax.f32 %v214_v53, %v215_v55 }
 0x110   :  { %v208_v58 = vrot.slane %v207_v56, 1  ;;  %v217_v59 = vrot.slane %v216_v57, 1 }
 0x112   :  { %v209_v60 = vmax.f32 %v207_v56, %v208_v58  ;;  %v218_v61 = vmax.f32 %v216_v57, %v217_v59 }
 0x114   :  { %v232_v62 = vsel %vm231_vm3, %v218_v61, %v209_v60 }
 0x115   :  { %350 = vmatmul.mubr.msk.f32.vlgmr.msra.gmra.mrb[4].mxu1 %vm200_vm2, %v232_v62 }
 0x1e8   :  { %v301_v0 = vpop.f32.mrb[4].mxu1 }
 0x1e9   :  { %v302_v1 = vadd.f32 %v337_v63, %v301_v0  ;;  %v351_v2 = vpop.f32.mrb[5].mxu1 }
 0x1eb   :  { %305 = vst [vmem:[#allocation2] sm:$0x3] %v302_v1 }
 0x1ec   :  { %407 = shalt.err (!%p404_p4)
}
 0x1ed   :  { %s408_s15 = scalar_lea.hbm %s546_s6, 32 }
 0x1ee   :  { %p409_p5 = scmp.ne.s32.totalorder %s546_s6, %s408_s15  ;;  %p412_p6 = scmp.lt.u32.totalorder %s408_s15, %s546_s6 }
 0x1f0   :  { %p414_p7 = pnand %p412_p6, %p409_p5 }
 0x1f2   :  { %417 = shalt.err (!%p414_p7)
}
 0x1f3   :  { %315 = dma.vmem_to_hbm [thread:$0]  %s313_s11, 32, %s546_s6, [#allocation3]  }
 0x1f4   :  { %418 = dma.done.wait [#allocation3], 32  }
 0x1f5   :  { %419 = vsyncadd [#allocation3], 4294967264 }
 0x1f6   :  { %319 = vsyncpa [#allocation3], 1 }

</bundles_post_ra>
